<compile_context>
chip_gen: v5e
topology: v5e:2x2
jax: 0.10.0
libtpu: 0.0.40
codegen_flags: <defaults>
</compile_context>

<pallas_src>
import jax
import jax.numpy as jnp
from jax.experimental import pallas as pl
from jax.experimental.pallas import tpu as pltpu

_LANE = 128
_SUBLANE = 8
_MAX_TILE_B = 2048   # (2048, 16) f32 state tile = 128 KiB; x2 buffers is trivial VMEM.


def _round_up(x, m):
    return ((x + m - 1) // m) * m


def _vnet_kernel(x_ref, w1_ref, w2_ref, p_ref, o_ref):
    """One batch tile of V(s) = fc3(relu(fc2(relu(fc1(s))))).

    x_ref : (TILE_B, IN8)      f32 state tile (feature dim NOT lane-padded)
    w1_ref: (IN8, F1P)         compute dtype (bf16 on TPU), zero-padded out-cols
    w2_ref: (F1P, F2P)         compute dtype, zero-padded
    p_ref : (4, max(F1P,F2P))  f32 packed rows = [b1; b2; w3_row; b3]
    o_ref : (TILE_B, 1)        f32
    """
    f1p = w1_ref.shape[1]
    f2p = w2_ref.shape[1]

    # Cast the streamed f32 state to the MXU input dtype in-kernel (cheaper than
    # an extra cast+materialize pass in the wrapper; HBM reads stay minimal).
    x = x_ref[...].astype(w1_ref.dtype)

    # fc1 + ReLU (MXU with K=IN8, f32 accumulation; bias add / relu on the VPU in f32).
    h1 = jnp.dot(x, w1_ref[...], preferred_element_type=jnp.float32)
    h1 = jnp.maximum(h1 + p_ref[0:1, 0:f1p], 0.0)

    # fc2 + ReLU (cast activations back to the MXU input dtype).
    h2 = jnp.dot(h1.astype(w2_ref.dtype), w2_ref[...],
                 preferred_element_type=jnp.float32)
    h2 = jnp.maximum(h2 + p_ref[1:2, 0:f2p], 0.0)

    # fc3 value head (output width 1): VPU multiply + XLU lane reduce instead of
    # burning an MXU pass for a single output column.
    w3_row = p_ref[2:3, 0:f2p]          # (1, F2P) f32, zero-padded past fc2_dims
    b3 = p_ref[3:4, 0:1]                # (1, 1)   f32
    v = jnp.sum(h2 * w3_row, axis=-1, keepdims=True) + b3

    # (tile_b, 1) output is lane-sparse (masked stores) but only 4*tile_b bytes
    # per tile -- negligible next to the 64-byte/row state stream.
    o_ref[...] = v.astype(o_ref.dtype)


def _compute_dtype():
    """bf16 MXU operands on every TPU generation (v5e's MXU takes bf16; all
    post-accumulation VPU math in the kernel is f32); f32 elsewhere."""
    try:
        return jnp.bfloat16 if jax.devices()[0].platform == "tpu" else jnp.float32
    except Exception:
        return jnp.float32


def _num_tensorcores():
    try:
        kind = jax.devices()[0].device_kind.lower()
    except Exception:
        return 1
    return 2 if "v7" in kind else 1   # v7x: 2 TensorCores per chip


def _batch_tiling(batch, num_cores):
    """Pick (tile_b, padded_batch, n_tiles): largest tile <= _MAX_TILE_B, batch
    padded only to tile_b * n_tiles (at most 8*(n_tiles) wasted rows), and on
    v7x force >=2 grid steps (when big enough) so both TensorCores get work."""
    b8 = _round_up(batch, _SUBLANE)
    n = -(-b8 // _MAX_TILE_B)                       # ceil
    if num_cores > 1 and n < num_cores and b8 >= 64:
        n = num_cores
    tile_b = _round_up(-(-b8 // n), _SUBLANE)
    return tile_b, tile_b * n, n


def prepare_vnet_params(w1, b1, w2, b2, w3, b3, compute_dtype=jnp.float32):
    """One-time weight prep (hoisted out of the per-call forward path):
    zero-pad hidden dims to lane-dense widths, cast matmul weights to the MXU
    dtype, and pack the small params into one (4, 128) f32 array."""
    in_d, f1 = w1.shape
    f2 = w2.shape[1]
    in8 = _round_up(in_d, _SUBLANE)   # K of fc1 only sublane-aligned, NOT 128-padded
    f1p = _round_up(f1, _LANE)
    f2p = _round_up(f2, _LANE)
    wp = max(f1p, f2p)

    w1_p = jnp.zeros((in8, f1p), compute_dtype).at[:in_d, :f1].set(
        w1.astype(compute_dtype))
    w2_p = jnp.zeros((f1p, f2p), compute_dtype).at[:f1, :f2].set(
        w2.astype(compute_dtype))

    p = jnp.zeros((4, wp), jnp.float32)
    p = p.at[0, :f1].set(jnp.reshape(b1, (-1,)).astype(jnp.float32))
    p = p.at[1, :f2].set(jnp.reshape(b2, (-1,)).astype(jnp.float32))
    p = p.at[2, :f2].set(jnp.reshape(w3, (-1,)).astype(jnp.float32))
    p = p.at[3, 0].set(jnp.reshape(b3, (-1,)).astype(jnp.float32)[0])
    return w1_p, w2_p, p


@jax.jit
def deep_v_network_forward(state, w1_p, w2_p, p):
    """state: (B, input_dims) f32; (w1_p, w2_p, p) from prepare_vnet_params.
    Returns V(state): (B, 1) f32."""
    B, in_d = state.shape
    in8, f1p = w1_p.shape
    f2p = w2_p.shape[1]
    wp = p.shape[1]

    tile_b, b_pad, n_tiles = _batch_tiling(B, _num_tensorcores())

    # Pad only if needed (common case: B % 8 == 0 and in_d already 8-aligned -> no-op,
    # the kernel reads the user's f32 state buffer directly).
    if (b_pad, in8) != (B, in_d):
        x_p = jnp.zeros((b_pad, in8), state.dtype).at[:B, :in_d].set(state)
    else:
        x_p = state

    out = pl.pallas_call(
        _vnet_kernel,
        out_shape=jax.ShapeDtypeStruct((b_pad, 1), jnp.float32),
        grid=(n_tiles,),
        in_specs=[
            # Activations stream over the batch grid (auto double-buffered);
            # feature dim stays at its real width (== full array dim -> legal).
            pl.BlockSpec((tile_b, in8), lambda i: (i, 0)),
            # Weights / packed params: constant block index -> VMEM-resident.
            pl.BlockSpec((in8, f1p), lambda i: (0, 0)),
            pl.BlockSpec((f1p, f2p), lambda i: (0, 0)),
            pl.BlockSpec((4, wp), lambda i: (0, 0)),
        ],
        out_specs=pl.BlockSpec((tile_b, 1), lambda i: (i, 0)),
        compiler_params=pltpu.CompilerParams(
            # Batch tiles are independent -> shard across TensorCores on v7x.
            dimension_semantics=("parallel",),
        ),
    )(x_p, w1_p, w2_p, p)

    return out[:B]


def init_linear_params(key, fan_in, fan_out):
    """Deterministic init mirroring PyTorch nn.Linear default U(-1/sqrt(in), 1/sqrt(in))."""
    kw, kb = jax.random.split(key)
    bound = 1.0 / jnp.sqrt(jnp.float32(fan_in))
    # Stored already transposed: (fan_in, fan_out)
    w = jax.random.uniform(kw, (fan_in, fan_out), jnp.float32, -bound, bound)
    b = jax.random.uniform(kb, (1, fan_out), jnp.float32, -bound, bound)
    return w, b


if __name__ == "__main__":
    # Small shapes consistent with the module: V(s) over a flat state vector.
    # TODO(synk): optimizer (AdamW) / .predict() device plumbing are host-side
    # training concerns, not part of the forward kernel (n_actions is unused by
    # the PyTorch forward).
    batch = 8
    input_dims = 16
    fc1_dims = 64
    fc2_dims = 32

    key = jax.random.PRNGKey(0)
    k_state, k1, k2, k3 = jax.random.split(key, 4)

    state = jax.random.normal(k_state, (batch, input_dims), jnp.float32)
    w1, b1 = init_linear_params(k1, input_dims, fc1_dims)
    w2, b2 = init_linear_params(k2, fc1_dims, fc2_dims)
    w3, b3 = init_linear_params(k3, fc2_dims, 1)

    cdt = _compute_dtype()
    # One-time weight prep (pad / cast / pack) hoisted out of the forward path.
    w1_p, w2_p, p = prepare_vnet_params(w1, b1, w2, b2, w3, b3, compute_dtype=cdt)

    v = deep_v_network_forward(state, w1_p, w2_p, p)
    v = jax.block_until_ready(v)

    # Pure-JAX reference with the same cast / f32-accumulation recipe as the kernel.
    xc = state.astype(cdt)
    h1 = jax.nn.relu(
        jnp.dot(xc, w1.astype(cdt), preferred_element_type=jnp.float32) + b1)
    h2 = jax.nn.relu(
        jnp.dot(h1.astype(cdt), w2.astype(cdt), preferred_element_type=jnp.float32) + b2)
    v_ref = h2 @ w3 + b3

    assert v.shape == (batch, 1)
    tol = 1e-5 if cdt == jnp.float32 else 2e-3
    assert jnp.allclose(v, v_ref, atol=tol, rtol=tol), float(jnp.max(jnp.abs(v - v_ref)))
    print("KERNEL_OK")
</pallas_src>

<mosaic_0001>
module attributes {stable_mosaic.version = 11 : i64} {
  func.func @_vnet_kernel(%arg0: i32, %arg1: memref<8x16xf32, #tpu.memory_space<vmem>>, %arg2: memref<16x128xf32, #tpu.memory_space<vmem>>, %arg3: memref<128x128xf32, #tpu.memory_space<vmem>>, %arg4: memref<4x128xf32, #tpu.memory_space<vmem>>, %arg5: memref<8x1xf32, #tpu.memory_space<vmem>>) attributes {dimension_semantics = [#tpu.dimension_semantics<parallel>], iteration_bounds = array<i64: 1>, scalar_prefetch = 0 : i64, scratch_operands = 0 : i64, tpu.core_type = #tpu.core_type<tc>, window_params = [{transform_indices = @transform_0, window_bounds = array<i64: 8, 16>}, {pipeline_mode = #tpu.pipeline_mode<synchronous>, transform_indices = @transform_1, window_bounds = array<i64: 16, 128>}, {pipeline_mode = #tpu.pipeline_mode<synchronous>, transform_indices = @transform_2, window_bounds = array<i64: 128, 128>}, {pipeline_mode = #tpu.pipeline_mode<synchronous>, transform_indices = @transform_3, window_bounds = array<i64: 4, 128>}, {transform_indices = @transform_4, window_bounds = array<i64: 8, 1>}]} {
    %c0 = arith.constant 0 : index
    %c0_0 = arith.constant 0 : index
    %0 = vector.load %arg1[%c0, %c0_0] : memref<8x16xf32, #tpu.memory_space<vmem>>, vector<8x16xf32>
    %c0_1 = arith.constant 0 : index
    %c0_2 = arith.constant 0 : index
    %1 = vector.load %arg2[%c0_1, %c0_2] : memref<16x128xf32, #tpu.memory_space<vmem>>, vector<16x128xf32>
    %cst = arith.constant dense<0.000000e+00> : vector<8x128xf32>
    %2 = tpu.matmul %0, %1, %cst {dimension_numbers = #tpu.dot_dimension_numbers<[1], [0], [0], [1], [0, 0, 1, 1], [], []>} : vector<8x16xf32>, vector<16x128xf32>, vector<8x128xf32> -> vector<8x128xf32>
    %c0_3 = arith.constant 0 : index
    %c0_4 = arith.constant 0 : index
    %3 = vector.load %arg4[%c0_3, %c0_4] : memref<4x128xf32, #tpu.memory_space<vmem>>, vector<1x128xf32>
    %4 = vector.broadcast %3 : vector<1x128xf32> to vector<8x128xf32>
    %5 = arith.addf %2, %4 : vector<8x128xf32>
    %cst_5 = arith.constant 0.000000e+00 : f32
    %6 = vector.broadcast %cst_5 : f32 to vector<8x128xf32>
    %7 = arith.maximumf %5, %6 : vector<8x128xf32>
    %c0_6 = arith.constant 0 : index
    %c0_7 = arith.constant 0 : index
    %8 = vector.load %arg3[%c0_6, %c0_7] : memref<128x128xf32, #tpu.memory_space<vmem>>, vector<128x128xf32>
    %cst_8 = arith.constant dense<0.000000e+00> : vector<8x128xf32>
    %9 = tpu.matmul %7, %8, %cst_8 {dimension_numbers = #tpu.dot_dimension_numbers<[1], [0], [0], [1], [0, 0, 1, 1], [], []>} : vector<8x128xf32>, vector<128x128xf32>, vector<8x128xf32> -> vector<8x128xf32>
    %c1 = arith.constant 1 : index
    %c0_9 = arith.constant 0 : index
    %10 = vector.load %arg4[%c1, %c0_9] : memref<4x128xf32, #tpu.memory_space<vmem>>, vector<1x128xf32>
    %11 = vector.broadcast %10 : vector<1x128xf32> to vector<8x128xf32>
    %12 = arith.addf %9, %11 : vector<8x128xf32>
    %cst_10 = arith.constant 0.000000e+00 : f32
    %13 = vector.broadcast %cst_10 : f32 to vector<8x128xf32>
    %14 = arith.maximumf %12, %13 : vector<8x128xf32>
    %c2 = arith.constant 2 : index
    %c0_11 = arith.constant 0 : index
    %15 = vector.load %arg4[%c2, %c0_11] : memref<4x128xf32, #tpu.memory_space<vmem>>, vector<1x128xf32>
    %c3 = arith.constant 3 : index
    %c0_12 = arith.constant 0 : index
    %16 = vector.load %arg4[%c3, %c0_12] : memref<4x128xf32, #tpu.memory_space<vmem>>, vector<1x1xf32>
    %17 = vector.broadcast %15 : vector<1x128xf32> to vector<8x128xf32>
    %18 = arith.mulf %14, %17 : vector<8x128xf32>
    %cst_13 = arith.constant dense<0.000000e+00> : vector<8xf32>
    %19 = vector.multi_reduction <add>, %18, %cst_13 [1] : vector<8x128xf32> to vector<8xf32>
    %20 = vector.shape_cast %19 : vector<8xf32> to vector<8x1xf32>
    %21 = vector.broadcast %16 : vector<1x1xf32> to vector<8x1xf32>
    %22 = arith.addf %20, %21 : vector<8x1xf32>
    %c0_14 = arith.constant 0 : index
    %c0_15 = arith.constant 0 : index
    %23 = vector.load %arg5[%c0_14, %c0_15] : memref<8x1xf32, #tpu.memory_space<vmem>>, vector<8x1xf32>
    tpu.vector_store %arg5[%c0_14, %c0_15], %22 {strides = array<i32>} : memref<8x1xf32, #tpu.memory_space<vmem>>, vector<8x1xf32>,
    return
  }
  func.func @transform_0(%arg0: i32) -> (i32, i32) {
    %c0_i32 = arith.constant 0 : i32
    %c0_i32_0 = arith.constant 0 : i32
    return %arg0, %c0_i32 : i32, i32
  }
  func.func @transform_1(%arg0: i32) -> (i32, i32) {
    %c0_i32 = arith.constant 0 : i32
    %c0_i32_0 = arith.constant 0 : i32
    %c0_i32_1 = arith.constant 0 : i32
    return %c0_i32, %c0_i32_0 : i32, i32
  }
  func.func @transform_2(%arg0: i32) -> (i32, i32) {
    %c0_i32 = arith.constant 0 : i32
    %c0_i32_0 = arith.constant 0 : i32
    %c0_i32_1 = arith.constant 0 : i32
    return %c0_i32, %c0_i32_0 : i32, i32
  }
  func.func @transform_3(%arg0: i32) -> (i32, i32) {
    %c0_i32 = arith.constant 0 : i32
    %c0_i32_0 = arith.constant 0 : i32
    %c0_i32_1 = arith.constant 0 : i32
    return %c0_i32, %c0_i32_0 : i32, i32
  }
  func.func @transform_4(%arg0: i32) -> (i32, i32) {
    %c0_i32 = arith.constant 0 : i32
    %c0_i32_0 = arith.constant 0 : i32
    return %arg0, %c0_i32 : i32, i32
  }
}

</mosaic_0001>

<bundles_post_ra>
// kernel: deep_v_network_forward.1
= control target key start
LH: loop header
LB: loop body
LE: loop exit
PB: predicated region body
PF: predicated region fallthrough
CT: control target
= control target key end

     0   :  { %9 = vsyncpa [#allocation3], 0  ;;  %s321_s0 = inlined_call_operand.hbm [shape: f32[8,16], index: 0, kind: input, shape index: {}]   ;;  %s322_s1 = inlined_call_operand.hbm [shape: f32[16,128], index: 1, kind: input, shape index: {}]   ;;  %s323_s2 = inlined_call_operand.hbm [shape: f32[128,128], index: 2, kind: input, shape index: {}]   ;;  %s324_s3 = inlined_call_operand.hbm [shape: f32[4,128], index: 3, kind: input, shape index: {}]   ;;  %s325_s4 = inlined_call_operand.vmem [shape: f32[8,1], index: 4, kind: output, shape index: {}]  }
   0x1   :  { %10 = vsyncpa [#allocation5], 0  ;;  %s27_s17 = sshll.u32 %s322_s1, 4  ;;  %s28_s17 = int_to_ptr.hbm [resolvable:$true] %s27_s17 }
   0x2   :  { %11 = vsyncpa [#allocation8], 0  ;;  %s275_s18 = smov [#allocation4]   ;;  %s17_s22 = sshll.u32 %s321_s0, 4  ;;  %s18_s22 = int_to_ptr.hbm [resolvable:$true] %s17_s22 }
   0x3   :  { %s29_s19 = sshll.u32 %s275_s18, 4  ;;  %s276_s23 = smov 128   ;;  %s30_s19 = int_to_ptr.vmem [resolvable:$true] %s29_s19 }
   0x4   :  { %s277_s24 = smov 8   ;;  %s278_s25 = smov [#allocation2]  }
   0x5   :  { %35 = dma.hbm_to_vmem [thread:$0]  %s28_s17, 256, %s30_s19, [#allocation5], %s276_s23, %s276_s23, %s277_s24  }
   0x6   :  { %s19_s26 = sshll.u32 %s278_s25, 4  ;;  %s40_s29 = sshll.u32 %s323_s2, 4  ;;  %s20_s26 = int_to_ptr.vmem [resolvable:$true] %s19_s26  ;;  %s41_s29 = int_to_ptr.hbm [resolvable:$true] %s40_s29 }
   0x7   :  { %22 = dma.hbm_to_vmem [thread:$0]  %s18_s22, 128, %s20_s26, [#allocation3]  }
   0x8   :  { %s54_s5 = sshll.u32 %s324_s3, 4  ;;  %s279_s6 = smov [#allocation6]   ;;  %s55_s5 = int_to_ptr.hbm [resolvable:$true] %s54_s5 }
   0x9   :  { %s42_s7 = sshll.u32 %s279_s6, 4  ;;  %s280_s0 = smov [#allocation7]   ;;  %s43_s7 = int_to_ptr.vmem [resolvable:$true] %s42_s7 }
   0xa   :  { %48 = dma.hbm_to_vmem [thread:$0]  %s41_s29, 2048, %s43_s7, [#allocation5], %s276_s23, %s276_s23, %s277_s24  }
   0xb   :  { %s56_s8 = sshll.u32 %s280_s0, 4  ;;  %s57_s8 = int_to_ptr.vmem [resolvable:$true] %s56_s8 }
   0xc   :  { %59 = dma.hbm_to_vmem [thread:$0]  %s55_s5, 64, %s57_s8, [#allocation8]  }
   0xd   :  { %269 = dma.done.wait [#allocation3], 128  }
   0xe   :  { %270 = vsyncadd [#allocation3], 4294967168 }
   0xf   :  { %271 = dma.done.wait [#allocation5], 2304  }
  0x10   :  { %272 = vsyncadd [#allocation5], 4294964992 }
  0x11   :  { %273 = dma.done.wait [#allocation8], 64  }
  0x12   :  { %274 = vsyncadd [#allocation8], 4294967232  ;;  %v78_v0 = vld [vmem:[#allocation4 + $0x8] sm:$0xff]  ;;  %v77_v1 = vld [vmem:[#allocation4] sm:$0xff]  ;;  %vm81_vm0 = vcmask 130048   ;;  %vm153_vm1 = vcmask 7168  }
  0x13   :  { %99 = vmatpush.msra.mxu0 %v78_v0  ;;  %v76_v2 = vld [vmem:[#allocation2] sm:$0xff]  ;;  %v121_v3 = vld [vmem:[#allocation6 + $0x78] sm:$0xff]  ;;  %v120_v4 = vld [vmem:[#allocation6 + $0x70] sm:$0xff] }
  0x14   :  { %124 = vmatpush.msra.mxu1 %v121_v3  ;;  %v119_v5 = vld [vmem:[#allocation6 + $0x68] sm:$0xff]  ;;  %v118_v6 = vld [vmem:[#allocation6 + $0x60] sm:$0xff]  ;;  %v117_v7 = vld [vmem:[#allocation6 + $0x58] sm:$0xff] }
  0x15   :  { %100 = vmatpush.msra.mxu0 %v77_v1  ;;  %v116_v8 = vld [vmem:[#allocation6 + $0x50] sm:$0xff]  ;;  %v115_v9 = vld [vmem:[#allocation6 + $0x48] sm:$0xff]  ;;  %v114_v10 = vld [vmem:[#allocation6 + $0x40] sm:$0xff] }
  0x16   :  { %162 = vmatmul.msk.f32.vlgmr.msra.gmra.mxu0 %vm81_vm0, %v76_v2  ;;  %125 = vmatpush.msra.mxu1 %v120_v4  ;;  %v113_v11 = vld [vmem:[#allocation6 + $0x38] sm:$0xff]  ;;  %v112_v12 = vld [vmem:[#allocation6 + $0x30] sm:$0xff]  ;;  %v111_v13 = vld [vmem:[#allocation6 + $0x28] sm:$0xff] }
  0x17   :  { %v110_v14 = vld [vmem:[#allocation6 + $0x20] sm:$0xff]  ;;  %v109_v15 = vld [vmem:[#allocation6 + $0x18] sm:$0xff]  ;;  %v108_v16 = vld [vmem:[#allocation6 + $0x10] sm:$0xff] }
  0x18   :  { %126 = vmatpush.msra.mxu1 %v119_v5  ;;  %v107_v17 = vld [vmem:[#allocation6 + $0x8] sm:$0xff]  ;;  %v106_v18 = vld [vmem:[#allocation6] sm:$0xff] }
  0x19   :  { %v169_v19 = vld [vmem:[#allocation7] ss:$0 sm:$0xff]  ;;  %v170_v23 = vld [vmem:[#allocation7 + $0x1] ss:$0 sm:$0xff]  ;;  %v171_v26 = vld [vmem:[#allocation7 + $0x2] ss:$0 sm:$0xff] }
  0x1a   :  { %127 = vmatpush.msra.mxu1 %v118_v6  ;;  %v172_v29 = vld [vmem:[#allocation7 + $0x3] ss:$0 sm:$0xff] }
  0x1c   :  { %128 = vmatpush.msra.mxu1 %v117_v7 }
  0x1e   :  { %129 = vmatpush.msra.mxu1 %v116_v8 }
  0x20   :  { %130 = vmatpush.msra.mxu1 %v115_v9 }
  0x22   :  { %131 = vmatpush.msra.mxu1 %v114_v10 }
  0x24   :  { %132 = vmatpush.msra.mxu1 %v113_v11 }
  0x26   :  { %133 = vmatpush.msra.mxu1 %v112_v12 }
  0x28   :  { %134 = vmatpush.msra.mxu1 %v111_v13 }
  0x2a   :  { %135 = vmatpush.msra.mxu1 %v110_v14 }
  0x2c   :  { %136 = vmatpush.msra.mxu1 %v109_v15 }
  0x2e   :  { %137 = vmatpush.msra.mxu1 %v108_v16 }
  0x30   :  { %138 = vmatpush.msra.mxu1 %v107_v17 }
  0x32   :  { %139 = vmatpush.msra.mxu1 %v106_v18 }
  0x93   :  { %v102_v20 = vpop.f32.mrf.mxu0 }
  0x94   :  { %v103_v21 = vadd.f32 %v169_v19, %v102_v20 }
  0x96   :  { %v105_v22 = vmax.f32 %v103_v21, 0.0 }
  0x98   :  { %140 = vmatmul.f32.vlgmr.msra.gmra.mxu1 %v105_v22 }
 0x115   :  { %v141_v24 = vpop.f32.mrf.mxu1 }
 0x116   :  { %v142_v25 = vadd.f32 %v170_v23, %v141_v24 }
 0x118   :  { %v144_v27 = vmax.f32 %v142_v25, 0.0 }
 0x11a   :  { %v148_v28 = vmul.f32 %v171_v26, %v144_v27 }
 0x11c   :  { %149 = vadd.xlane.f32.xlu0 %v148_v28 }
 0x18f   :  { %v150_v30 = vpop.xlane.xlu0 %149 }
 0x190   :  { %v152_v31 = vadd.f32 %v172_v29, %v150_v30 }
 0x192   :  { %154 = vst.msk [vmem:[%s325_s4] sm:$0xff] %vm153_vm1, %v152_v31 }
 0x193   :  { %159 = vsyncpa [#allocation3], 1 }
 0x194   :  { %160 = vsyncpa [#allocation5], 1 }
 0x195   :  { %161 = vsyncpa [#allocation8], 1 }

</bundles_post_ra>
